<compile_context>
chip_gen: v6e
topology: v6e:2x2x1
jax: 0.10.0
libtpu: 0.0.40
codegen_flags: <defaults>
</compile_context>

<pallas_src>
import jax
import jax.numpy as jnp
from jax.experimental import pallas as pl
from jax.experimental.pallas import tpu as pltpu


def _fused_linear_kernel(x_ref, w_ref, b_ref, o_ref):
    # x_ref: [TM, D], w_ref: [D, Npad], b_ref: [1, Npad], o_ref: [TM, Npad]
    o_ref[...] = (
        jnp.dot(x_ref[...], w_ref[...], preferred_element_type=jnp.float32)
        + b_ref[...]
    ).astype(o_ref.dtype)


def _round_up(x, m):
    return ((x + m - 1) // m) * m


def localization_output_pallas(x, w_packed, b_packed, max_num_sources):
    """x: [B, T, D] float32.

    w_packed: [D, 3*S] with columns [sa_0..sa_{S-1}, az_0, el_0, ..., az_{S-1}, el_{S-1}]
    b_packed: [3*S] in the same column order.

    Returns (source_activity [B, T, S], direction_of_arrival [B, T, S, 2]).
    """
    B, T, D = x.shape
    S = max_num_sources
    N = 3 * S
    M = B * T

    # Lane-dense padded head dimension (multiple of 128).
    Npad = _round_up(max(N, 128), 128)

    # Tile selection: single block for toy sizes, 512-row tiles otherwise.
    if M <= 512:
        TM = M
        M_pad = M
    else:
        TM = 512
        M_pad = _round_up(M, TM)

    x2d = x.reshape(M, D).astype(jnp.float32)
    if M_pad != M:
        x2d = jnp.pad(x2d, ((0, M_pad - M), (0, 0)))

    # Zero-pad the packed heads out to Npad lanes (padding columns are inert).
    wp = jnp.pad(w_packed.astype(jnp.float32), ((0, 0), (0, Npad - N)))
    bp = jnp.pad(b_packed.astype(jnp.float32), (0, Npad - N)).reshape(1, Npad)

    out = pl.pallas_call(
        _fused_linear_kernel,
        out_shape=jax.ShapeDtypeStruct((M_pad, Npad), jnp.float32),
        grid=(M_pad // TM,),
        in_specs=[
            pl.BlockSpec((TM, D), lambda i: (i, 0)),      # x tile, pipelined over M
            pl.BlockSpec((D, Npad), lambda i: (0, 0)),    # weights resident
            pl.BlockSpec((1, Npad), lambda i: (0, 0)),    # bias resident
        ],
        out_specs=pl.BlockSpec((TM, Npad), lambda i: (i, 0)),
        compiler_params=pltpu.CompilerParams(
            dimension_semantics=("parallel",),
        ),
    )(x2d, wp, bp)

    out = out[:M, :N].reshape(B, T, N)
    source_activity = out[..., :S]                              # [B, T, S]
    direction_of_arrival = out[..., S:].reshape(B, T, S, 2)     # [..., s, 0]=az, [..., s, 1]=el
    return source_activity, direction_of_arrival


def init_params(key, input_dim, max_num_sources):
    """Deterministic init mimicking nn.Linear's uniform(-1/sqrt(D), 1/sqrt(D)).

    Returns (w_packed [D, 3S], b_packed [3S], heads) where heads holds the
    unpacked per-head weights/biases for reference checking.
    """
    D, S = input_dim, max_num_sources
    bound = 1.0 / jnp.sqrt(jnp.float32(D))
    ks = jax.random.split(key, 6)
    # PyTorch Linear weight is [out, in]; store transposed [in, out].
    w_sa = jax.random.uniform(ks[0], (D, S), jnp.float32, -bound, bound)
    w_az = jax.random.uniform(ks[1], (D, S), jnp.float32, -bound, bound)
    w_el = jax.random.uniform(ks[2], (D, S), jnp.float32, -bound, bound)
    b_sa = jax.random.uniform(ks[3], (S,), jnp.float32, -bound, bound)
    b_az = jax.random.uniform(ks[4], (S,), jnp.float32, -bound, bound)
    b_el = jax.random.uniform(ks[5], (S,), jnp.float32, -bound, bound)

    # Interleave az/el columns so DOA falls out as a contiguous reshape.
    w_doa = jnp.stack([w_az, w_el], axis=-1).reshape(D, 2 * S)   # az0,el0,az1,el1,...
    b_doa = jnp.stack([b_az, b_el], axis=-1).reshape(2 * S)
    w_packed = jnp.concatenate([w_sa, w_doa], axis=1)            # [D, 3S]
    b_packed = jnp.concatenate([b_sa, b_doa], axis=0)            # [3S]

    heads = (w_sa, b_sa, w_az, b_az, w_el, b_el)
    return w_packed, b_packed, heads


def _reference(x, heads):
    """Plain-JAX replica of the PyTorch forward."""
    w_sa, b_sa, w_az, b_az, w_el, b_el = heads
    sa = x @ w_sa + b_sa
    az = x @ w_az + b_az
    el = x @ w_el + b_el
    doa = jnp.concatenate((az[..., None], el[..., None]), axis=-1)
    return sa, doa


if __name__ == "__main__":
    key = jax.random.PRNGKey(0)

    # --- Small shape (single-block path), consistent with the module: [B, T, D] ---
    B, T, D, S = 2, 8, 32, 4
    k_x, k_p, k_x2, k_p2 = jax.random.split(key, 4)

    x = jax.random.normal(k_x, (B, T, D), dtype=jnp.float32)
    w_packed, b_packed, heads = init_params(k_p, D, S)

    sa, doa = localization_output_pallas(x, w_packed, b_packed, S)
    jax.block_until_ready((sa, doa))

    ref_sa, ref_doa = _reference(x, heads)
    assert sa.shape == (B, T, S)
    assert doa.shape == (B, T, S, 2)
    assert jnp.allclose(sa, ref_sa, atol=1e-5, rtol=1e-5)
    assert jnp.allclose(doa, ref_doa, atol=1e-5, rtol=1e-5)

    # --- Larger shape to exercise the tiled (M > 512) + row-padded path ---
    B2, T2, D2, S2 = 4, 300, 128, 4
    x2 = jax.random.normal(k_x2, (B2, T2, D2), dtype=jnp.float32)
    w_packed2, b_packed2, heads2 = init_params(k_p2, D2, S2)

    sa2, doa2 = localization_output_pallas(x2, w_packed2, b_packed2, S2)
    jax.block_until_ready((sa2, doa2))

    ref_sa2, ref_doa2 = _reference(x2, heads2)
    assert sa2.shape == (B2, T2, S2)
    assert doa2.shape == (B2, T2, S2, 2)
    assert jnp.allclose(sa2, ref_sa2, atol=1e-4, rtol=1e-4)
    assert jnp.allclose(doa2, ref_doa2, atol=1e-4, rtol=1e-4)

    print("KERNEL_OK")
</pallas_src>

<mosaic_0001>
module attributes {stable_mosaic.version = 11 : i64} {
  func.func @_fused_linear_kernel(%arg0: i32, %arg1: memref<16x32xf32, #tpu.memory_space<vmem>>, %arg2: memref<32x128xf32, #tpu.memory_space<vmem>>, %arg3: memref<1x128xf32, #tpu.memory_space<vmem>>, %arg4: memref<16x128xf32, #tpu.memory_space<vmem>>) attributes {dimension_semantics = [#tpu.dimension_semantics<parallel>], iteration_bounds = array<i64: 1>, scalar_prefetch = 0 : i64, scratch_operands = 0 : i64, tpu.core_type = #tpu.core_type<tc>, window_params = [{transform_indices = @transform_0, window_bounds = array<i64: 16, 32>}, {pipeline_mode = #tpu.pipeline_mode<synchronous>, transform_indices = @transform_1, window_bounds = array<i64: 32, 128>}, {pipeline_mode = #tpu.pipeline_mode<synchronous>, transform_indices = @transform_2, window_bounds = array<i64: 1, 128>}, {transform_indices = @transform_3, window_bounds = array<i64: 16, 128>}]} {
    %c0 = arith.constant 0 : index
    %c0_0 = arith.constant 0 : index
    %0 = vector.load %arg1[%c0, %c0_0] : memref<16x32xf32, #tpu.memory_space<vmem>>, vector<16x32xf32>
    %c0_1 = arith.constant 0 : index
    %c0_2 = arith.constant 0 : index
    %1 = vector.load %arg2[%c0_1, %c0_2] : memref<32x128xf32, #tpu.memory_space<vmem>>, vector<32x128xf32>
    %cst = arith.constant dense<0.000000e+00> : vector<16x128xf32>
    %2 = tpu.matmul %0, %1, %cst {dimension_numbers = #tpu.dot_dimension_numbers<[1], [0], [0], [1], [0, 0, 1, 1], [], []>} : vector<16x32xf32>, vector<32x128xf32>, vector<16x128xf32> -> vector<16x128xf32>
    %c0_3 = arith.constant 0 : index
    %c0_4 = arith.constant 0 : index
    %3 = vector.load %arg3[%c0_3, %c0_4] : memref<1x128xf32, #tpu.memory_space<vmem>>, vector<1x128xf32>
    %4 = vector.broadcast %3 : vector<1x128xf32> to vector<16x128xf32>
    %5 = arith.addf %2, %4 : vector<16x128xf32>
    %c0_5 = arith.constant 0 : index
    %c0_6 = arith.constant 0 : index
    %6 = vector.load %arg4[%c0_5, %c0_6] : memref<16x128xf32, #tpu.memory_space<vmem>>, vector<16x128xf32>
    tpu.vector_store %arg4[%c0_5, %c0_6], %5 {strides = array<i32>} : memref<16x128xf32, #tpu.memory_space<vmem>>, vector<16x128xf32>,
    return
  }
  func.func @transform_0(%arg0: i32) -> (i32, i32) {
    %c0_i32 = arith.constant 0 : i32
    %c0_i32_0 = arith.constant 0 : i32
    return %arg0, %c0_i32 : i32, i32
  }
  func.func @transform_1(%arg0: i32) -> (i32, i32) {
    %c0_i32 = arith.constant 0 : i32
    %c0_i32_0 = arith.constant 0 : i32
    %c0_i32_1 = arith.constant 0 : i32
    return %c0_i32, %c0_i32_0 : i32, i32
  }
  func.func @transform_2(%arg0: i32) -> (i32, i32) {
    %c0_i32 = arith.constant 0 : i32
    %c0_i32_0 = arith.constant 0 : i32
    %c0_i32_1 = arith.constant 0 : i32
    return %c0_i32, %c0_i32_0 : i32, i32
  }
  func.func @transform_3(%arg0: i32) -> (i32, i32) {
    %c0_i32 = arith.constant 0 : i32
    %c0_i32_0 = arith.constant 0 : i32
    return %arg0, %c0_i32 : i32, i32
  }
}

</mosaic_0001>

<bundles_post_ra>
// kernel: tpu_custom_call.1
= control target key start
LH: loop header
LB: loop body
LE: loop exit
PB: predicated region body
PF: predicated region fallthrough
CT: control target
= control target key end

     0   :  { %8 = vsyncpa [#allocation3], 0  ;;  %s297_s0 = inlined_call_operand.hbm [shape: f32[16,32], index: 0, kind: input, shape index: {}]   ;;  %s298_s1 = inlined_call_operand.hbm [shape: f32[32,128], index: 1, kind: input, shape index: {}]   ;;  %s299_s2 = inlined_call_operand.vmem [shape: f32[1,128], index: 2, kind: input, shape index: {}]   ;;  %s300_s3 = inlined_call_operand.hbm [shape: f32[16,128], index: 3, kind: output, shape index: {}]  }
   0x1   :  { %9 = vsyncpa [#allocation6], 0 }
   0x2   :  { %10 = vsyncpa [#allocation4], 0  ;;  %s249_s12 = smov [#allocation2]  }
   0x3   :  { %s16_s13 = sshll.u32 %s249_s12, 4  ;;  %s17_s13 = int_to_ptr.vmem [resolvable:$true] %s16_s13 }
   0x4   :  { %s191_s14 = scalar_lea.vmem %s17_s13, 256  ;;  %p196_p1 = scmp.lt.s32.totalorder %s17_s13, %s17_s13 }
   0x5   :  { %p192_p0 = scmp.ne.s32.totalorder %s17_s13, %s191_s14  ;;  %p197_p2 = scmp.lt.s32.totalorder %s191_s14, %s191_s14 }
   0x7   :  { %p198_p3 = por %p197_p2, %p196_p1 }
   0x9   :  { %p199_p4 = pnand %p198_p3, %p192_p0 }
   0xb   :  { %202 = shalt.err (!%p199_p4)
}
   0xc   :  { %s250_s15 = smov 128   ;;  %s251_s16 = smov 8  }
   0xd   :  { %22 = dma.hbm_to_vmem [thread:$0]  %s297_s0, 256, %s17_s13, [#allocation3], %s250_s15, %s250_s15, %s251_s16  }
   0xe   :  { %s252_s19 = smov [#allocation5]  }
   0xf   :  { %s28_s20 = sshll.u32 %s252_s19, 4  ;;  %s29_s20 = int_to_ptr.vmem [resolvable:$true] %s28_s20 }
  0x10   :  { %s211_s21 = scalar_lea.vmem %s29_s20, 512  ;;  %p216_p6 = scmp.lt.s32.totalorder %s29_s20, %s29_s20 }
  0x11   :  { %p212_p5 = scmp.ne.s32.totalorder %s29_s20, %s211_s21  ;;  %p217_p7 = scmp.lt.s32.totalorder %s211_s21, %s211_s21 }
  0x13   :  { %p218_p8 = por %p217_p7, %p216_p6 }
  0x15   :  { %p219_p9 = pnand %p218_p8, %p212_p5 }
  0x17   :  { %222 = shalt.err (!%p219_p9)
}
  0x18   :  { %34 = dma.hbm_to_vmem [thread:$0]  %s298_s1, 512, %s29_s20, [#allocation6], %s250_s15, %s250_s15, %s251_s16  }
  0x19   :  { %243 = dma.done.wait [#allocation3], 256  }
  0x1a   :  { %244 = vsyncadd [#allocation3], 4294967040 }
  0x1b   :  { %245 = dma.done.wait [#allocation6], 512  }
  0x1c   :  { %246 = vsyncadd [#allocation6], 4294966784  ;;  %vm56_vm0 = vcmask 261120   ;;  %v48_v0 = vld [vmem:[#allocation5 + $0x18] sm:$0xff]  ;;  %v47_v1 = vld [vmem:[#allocation5 + $0x10] sm:$0xff]  ;;  %s253_s24 = smov [#allocation7]  }
  0x1d   :  { %167 = vmatprep.subr.mxu0 %v48_v0  ;;  %v43_v2 = vld [vmem:[#allocation2] sm:$0xff]  ;;  %v46_v3 = vld [vmem:[#allocation5 + $0x8] sm:$0xff]  ;;  %v45_v4 = vld [vmem:[#allocation5] sm:$0xff]  ;;  %s145_s25 = sshll.u32 %s253_s24, 4  ;;  %s146_s25 = int_to_ptr.vmem [resolvable:$true] %s145_s25 }
  0x1e   :  { %168 = vmatpush3.msra.mxu0 %v48_v0  ;;  %175 = vmatprep.mubr.msk.f32.mxu0 %vm56_vm0, %v43_v2  ;;  %v44_v5 = vld [vmem:[#allocation2 + $0x8] sm:$0xff]  ;;  %v158_v6 = vld [vmem:[%s299_s2] ss:$0 sm:$0xff]  ;;  %s223_s26 = scalar_lea.vmem %s146_s25, 256  ;;  %p228_p11 = scmp.lt.s32.totalorder %s146_s25, %s146_s25 }
  0x1f   :  { %169 = vmatprep.subr.mxu0 %v47_v1  ;;  %p224_p10 = scmp.ne.s32.totalorder %s146_s25, %s223_s26  ;;  %p229_p12 = scmp.lt.s32.totalorder %s223_s26, %s223_s26 }
  0x20   :  { %170 = vmatpush3.msra.mxu0 %v47_v1 }
  0x21   :  { %171 = vmatprep.subr.mxu0 %v46_v3  ;;  %p230_p13 = por %p229_p12, %p228_p11 }
  0x22   :  { %172 = vmatpush3.msra.mxu0 %v46_v3 }
  0x23   :  { %173 = vmatprep.subr.mxu0 %v45_v4  ;;  %p231_p0 = pnand %p230_p13, %p224_p10 }
  0x24   :  { %174 = vmatpush3.msra.mxu0 %v45_v4 }
  0x25   :  { %176 = vmatmul.mubr.msk.f32.vlgmr.msra.gmra.mxu0 %vm56_vm0, %v44_v5 }
  0xe5   :  { %v177_v7 = vpop.f32.mrf.mxu0 }
  0xe6   :  { %v135_v8 = vadd.f32 %v177_v7, %v158_v6 }
  0xe7   :  { %v129_v9 = vpop.f32.mrf.mxu0 }
  0xe8   :  { %139 = vst [vmem:[#allocation7 + $0x8] sm:$0xff] %v135_v8  ;;  %v130_v10 = vadd.f32 %v158_v6, %v129_v9 }
  0xea   :  { %138 = vst [vmem:[#allocation7] sm:$0xff] %v130_v10 }
  0xeb   :  { %234 = shalt.err (!%p231_p0)
}
  0xec   :  { %151 = dma.vmem_to_hbm [thread:$0]  %s146_s25, 256, %s300_s3, [#allocation4], %s250_s15, %s250_s15, %s251_s16  }
  0xed   :  { %247 = dma.done.wait [#allocation4], 256  }
  0xee   :  { %248 = vsyncadd [#allocation4], 4294967040 }
  0xef   :  { %155 = vsyncpa [#allocation3], 1 }
  0xf0   :  { %156 = vsyncpa [#allocation6], 1 }
  0xf1   :  { %157 = vsyncpa [#allocation4], 1 }

</bundles_post_ra>
